<compile_context>
chip_gen: v5e
topology: v5e:2x2
jax: 0.10.0
libtpu: 0.0.40
codegen_flags: <defaults>
</compile_context>

<pallas_src>
import functools

import jax
import jax.numpy as jnp
from jax.experimental import pallas as pl
from jax.experimental.pallas import tpu as pltpu

LANE = 128      # TPU lane width: feature dims padded to a multiple of this
SUBLANE = 8     # f32 sublane count: batch padded to a multiple of this


def _round_up(n: int, m: int) -> int:
    return ((n + m - 1) // m) * m


def _make_mlp_kernel(num_layers: int):
    """Fused MLP kernel: Linear -> ReLU -> ... -> Linear (no final ReLU).

    Ref order: x_ref, w0, b0, w1, b1, ..., o_ref.  All whole-array VMEM
    blocks; intermediate activations stay in vregs/VMEM between layers.
    """
    def kernel(x_ref, *refs):
        o_ref = refs[-1]
        h = x_ref[...]
        for i in range(num_layers):
            w = refs[2 * i][...]
            b = refs[2 * i + 1][...]
            h = jnp.dot(h, w, preferred_element_type=jnp.float32) + b
            if i < num_layers - 1:
                h = jnp.maximum(h, 0.0)
        o_ref[...] = h.astype(o_ref.dtype)
    return kernel


def init_network_params(key, in_dim: int, out_dim: int, hidden_dims: list[int]):
    """Deterministic params matching nn.Linear shapes (weight: (out, in))."""
    shape = [in_dim] + hidden_dims + [out_dim]
    params = []
    for i in range(len(shape) - 1):
        fan_in, fan_out = shape[i], shape[i + 1]
        key, wk, bk = jax.random.split(key, 3)
        bound = 1.0 / jnp.sqrt(fan_in)
        w = jax.random.uniform(wk, (fan_out, fan_in), jnp.float32, -bound, bound)
        b = jax.random.uniform(bk, (fan_out,), jnp.float32, -bound, bound)
        params.append((w, b))
    return params


def prepare_padded_params(params):
    """One-time (hoisted) transform: transpose to (in, out) and zero-pad to 128.

    Zero padding is inert: padded weight rows/cols and bias lanes contribute 0,
    and ReLU(0) == 0, so the extra lanes stay 0 through the whole stack.
    """
    padded = []
    for w, b in params:
        fan_out, fan_in = w.shape
        pin, pout = _round_up(fan_in, LANE), _round_up(fan_out, LANE)
        w_t = jnp.zeros((pin, pout), jnp.float32).at[:fan_in, :fan_out].set(w.T)
        b2 = jnp.zeros((1, pout), jnp.float32).at[:, :fan_out].set(b)
        padded.append((w_t, b2))
    return padded


def network_forward(x: jax.Array, padded_params, out_dim: int) -> jax.Array:
    """Whole MLP in one fused Pallas kernel (no grid; everything fits in VMEM)."""
    batch, d_in = x.shape
    num_layers = len(padded_params)
    pin0 = padded_params[0][0].shape[0]
    pout_last = padded_params[-1][0].shape[1]
    pb = _round_up(batch, SUBLANE)

    # Zero-pad the input once; padded rows/lanes stay zero through the stack.
    x_pad = jnp.zeros((pb, pin0), jnp.float32).at[:batch, :d_in].set(x)

    flat_params = []
    flops = 0
    bytes_accessed = x_pad.size * 4 + pb * pout_last * 4
    for w_t, b2 in padded_params:
        flat_params.extend((w_t, b2))
        flops += 2 * pb * w_t.shape[0] * w_t.shape[1]
        bytes_accessed += (w_t.size + b2.size) * 4

    kernel = _make_mlp_kernel(num_layers)
    vmem_spec = pl.BlockSpec(memory_space=pltpu.MemorySpace.VMEM)
    out_pad = pl.pallas_call(
        kernel,
        out_shape=jax.ShapeDtypeStruct((pb, pout_last), jnp.float32),
        in_specs=[vmem_spec] * (1 + 2 * num_layers),
        out_specs=vmem_spec,
        cost_estimate=pl.CostEstimate(
            flops=flops, transcendentals=0, bytes_accessed=bytes_accessed),
    )(x_pad, *flat_params)

    # Strip the padding in the wrapper (cheap slice of a tiny array).
    return out_pad[:batch, :out_dim]


if __name__ == "__main__":
    key = jax.random.PRNGKey(0)
    in_dim, out_dim, hidden_dims = 32, 16, [64, 48]
    batch = 8

    key, pkey, xkey = jax.random.split(key, 3)
    params = init_network_params(pkey, in_dim, out_dim, hidden_dims)
    padded_params = prepare_padded_params(params)   # hoisted: done once at init
    x = jax.random.normal(xkey, (batch, in_dim), jnp.float32)

    fwd = jax.jit(functools.partial(network_forward, out_dim=out_dim))
    out = fwd(x, padded_params)
    jax.block_until_ready(out)

    # Sanity check against pure-JAX reference on the ORIGINAL (unpadded) params.
    ref = x
    for i, (w, b) in enumerate(params):
        ref = ref @ w.T + b
        if i < len(params) - 1:
            ref = jnp.maximum(ref, 0.0)
    assert out.shape == (batch, out_dim)
    assert jnp.allclose(out, ref, atol=1e-5, rtol=1e-5)

    print("KERNEL_OK")
</pallas_src>

<mosaic_0001>
module attributes {stable_mosaic.version = 11 : i64} {
  func.func @kernel(%arg0: memref<8x128xf32, #tpu.memory_space<vmem>>, %arg1: memref<128x128xf32, #tpu.memory_space<vmem>>, %arg2: memref<1x128xf32, #tpu.memory_space<vmem>>, %arg3: memref<128x128xf32, #tpu.memory_space<vmem>>, %arg4: memref<1x128xf32, #tpu.memory_space<vmem>>, %arg5: memref<128x128xf32, #tpu.memory_space<vmem>>, %arg6: memref<1x128xf32, #tpu.memory_space<vmem>>, %arg7: memref<8x128xf32, #tpu.memory_space<vmem>>) attributes {dimension_semantics = [], scalar_prefetch = 0 : i64, scratch_operands = 0 : i64, tpu.core_type = #tpu.core_type<tc>} {
    %c0 = arith.constant 0 : index
    %c0_0 = arith.constant 0 : index
    %0 = vector.load %arg0[%c0, %c0_0] : memref<8x128xf32, #tpu.memory_space<vmem>>, vector<8x128xf32>
    %c0_1 = arith.constant 0 : index
    %c0_2 = arith.constant 0 : index
    %1 = vector.load %arg1[%c0_1, %c0_2] : memref<128x128xf32, #tpu.memory_space<vmem>>, vector<128x128xf32>
    %c0_3 = arith.constant 0 : index
    %c0_4 = arith.constant 0 : index
    %2 = vector.load %arg2[%c0_3, %c0_4] : memref<1x128xf32, #tpu.memory_space<vmem>>, vector<1x128xf32>
    %cst = arith.constant dense<0.000000e+00> : vector<8x128xf32>
    %3 = tpu.matmul %0, %1, %cst {dimension_numbers = #tpu.dot_dimension_numbers<[1], [0], [0], [1], [0, 0, 1, 1], [], []>} : vector<8x128xf32>, vector<128x128xf32>, vector<8x128xf32> -> vector<8x128xf32>
    %4 = vector.broadcast %2 : vector<1x128xf32> to vector<8x128xf32>
    %5 = arith.addf %3, %4 : vector<8x128xf32>
    %cst_5 = arith.constant 0.000000e+00 : f32
    %6 = vector.broadcast %cst_5 : f32 to vector<8x128xf32>
    %7 = arith.maximumf %5, %6 : vector<8x128xf32>
    %c0_6 = arith.constant 0 : index
    %c0_7 = arith.constant 0 : index
    %8 = vector.load %arg3[%c0_6, %c0_7] : memref<128x128xf32, #tpu.memory_space<vmem>>, vector<128x128xf32>
    %c0_8 = arith.constant 0 : index
    %c0_9 = arith.constant 0 : index
    %9 = vector.load %arg4[%c0_8, %c0_9] : memref<1x128xf32, #tpu.memory_space<vmem>>, vector<1x128xf32>
    %cst_10 = arith.constant dense<0.000000e+00> : vector<8x128xf32>
    %10 = tpu.matmul %7, %8, %cst_10 {dimension_numbers = #tpu.dot_dimension_numbers<[1], [0], [0], [1], [0, 0, 1, 1], [], []>} : vector<8x128xf32>, vector<128x128xf32>, vector<8x128xf32> -> vector<8x128xf32>
    %11 = vector.broadcast %9 : vector<1x128xf32> to vector<8x128xf32>
    %12 = arith.addf %10, %11 : vector<8x128xf32>
    %cst_11 = arith.constant 0.000000e+00 : f32
    %13 = vector.broadcast %cst_11 : f32 to vector<8x128xf32>
    %14 = arith.maximumf %12, %13 : vector<8x128xf32>
    %c0_12 = arith.constant 0 : index
    %c0_13 = arith.constant 0 : index
    %15 = vector.load %arg5[%c0_12, %c0_13] : memref<128x128xf32, #tpu.memory_space<vmem>>, vector<128x128xf32>
    %c0_14 = arith.constant 0 : index
    %c0_15 = arith.constant 0 : index
    %16 = vector.load %arg6[%c0_14, %c0_15] : memref<1x128xf32, #tpu.memory_space<vmem>>, vector<1x128xf32>
    %cst_16 = arith.constant dense<0.000000e+00> : vector<8x128xf32>
    %17 = tpu.matmul %14, %15, %cst_16 {dimension_numbers = #tpu.dot_dimension_numbers<[1], [0], [0], [1], [0, 0, 1, 1], [], []>} : vector<8x128xf32>, vector<128x128xf32>, vector<8x128xf32> -> vector<8x128xf32>
    %18 = vector.broadcast %16 : vector<1x128xf32> to vector<8x128xf32>
    %19 = arith.addf %17, %18 : vector<8x128xf32>
    %c0_17 = arith.constant 0 : index
    %c0_18 = arith.constant 0 : index
    %20 = vector.load %arg7[%c0_17, %c0_18] : memref<8x128xf32, #tpu.memory_space<vmem>>, vector<8x128xf32>
    tpu.vector_store %arg7[%c0_17, %c0_18], %19 {strides = array<i32>} : memref<8x128xf32, #tpu.memory_space<vmem>>, vector<8x128xf32>,
    return
  }
}

</mosaic_0001>

<bundles_post_ra>
// kernel: network_forward.1
= control target key start
LH: loop header
LB: loop body
LE: loop exit
PB: predicated region body
PF: predicated region fallthrough
CT: control target
= control target key end

     0   :  { %12 = vsyncpa [#allocation3], 0  ;;  %s397_s0 = inlined_call_operand.vmem [shape: f32[8,128], index: 0, kind: input, shape index: {}]   ;;  %s398_s1 = inlined_call_operand.hbm [shape: f32[128,128], index: 1, kind: input, shape index: {}]   ;;  %s399_s2 = inlined_call_operand.vmem [shape: f32[1,128], index: 2, kind: input, shape index: {}]   ;;  %s400_s3 = inlined_call_operand.hbm [shape: f32[128,128], index: 3, kind: input, shape index: {}]   ;;  %s401_s4 = inlined_call_operand.vmem [shape: f32[1,128], index: 4, kind: input, shape index: {}]   ;;  %s402_s5 = inlined_call_operand.hbm [shape: f32[128,128], index: 5, kind: input, shape index: {}]   ;;  %s403_s6 = inlined_call_operand.vmem [shape: f32[1,128], index: 6, kind: input, shape index: {}]   ;;  %s404_s7 = inlined_call_operand.hbm [shape: f32[8,128], index: 7, kind: output, shape index: {}]  }
   0x1   :  { %13 = vsyncpa [#allocation6], 0 }
   0x2   :  { %14 = vsyncpa [#allocation4], 0  ;;  %s36_s26 = sshll.u32 %s400_s3, 4  ;;  %s327_s27 = smov [#allocation5]   ;;  %s37_s26 = int_to_ptr.hbm [resolvable:$true] %s36_s26 }
   0x3   :  { %s38_s28 = sshll.u32 %s327_s27, 4  ;;  %s21_s8 = sshll.u32 %s398_s1, 4  ;;  %s39_s28 = int_to_ptr.vmem [resolvable:$true] %s38_s28  ;;  %s22_s8 = int_to_ptr.hbm [resolvable:$true] %s21_s8 }
   0x4   :  { %s328_s9 = smov 128   ;;  %s329_s10 = smov 8  }
   0x5   :  { %44 = dma.hbm_to_vmem [thread:$0]  %s37_s26, 2048, %s39_s28, [#allocation6], %s328_s9, %s328_s9, %s329_s10  }
   0x6   :  { %s330_s11 = smov [#allocation2]   ;;  %s51_s15 = sshll.u32 %s402_s5, 4  ;;  %s52_s15 = int_to_ptr.hbm [resolvable:$true] %s51_s15 }
   0x7   :  { %s23_s12 = sshll.u32 %s330_s11, 4  ;;  %s331_s3 = smov [#allocation7]   ;;  %s24_s12 = int_to_ptr.vmem [resolvable:$true] %s23_s12 }
   0x8   :  { %29 = dma.hbm_to_vmem [thread:$0]  %s22_s8, 2048, %s24_s12, [#allocation3], %s328_s9, %s328_s9, %s329_s10  }
   0x9   :  { %s53_s16 = sshll.u32 %s331_s3, 4  ;;  %s54_s16 = int_to_ptr.vmem [resolvable:$true] %s53_s16 }
   0xa   :  { %59 = dma.hbm_to_vmem [thread:$0]  %s52_s15, 2048, %s54_s16, [#allocation6], %s328_s9, %s328_s9, %s329_s10  }
   0xb   :  { %321 = dma.done.wait [#allocation3], 2048  }
   0xc   :  { %322 = vsyncadd [#allocation3], 4294965248 }
   0xd   :  { %323 = dma.done.wait [#allocation6], 4096  }
   0xe   :  { %324 = vsyncadd [#allocation6], 4294963200  ;;  %v90_v0 = vld [vmem:[#allocation2 + $0x78] sm:$0xff]  ;;  %v89_v1 = vld [vmem:[#allocation2 + $0x70] sm:$0xff]  ;;  %s332_s21 = smov [#allocation8]   ;;  %s205_s25 = sshll.u32 %s404_s7, 4  ;;  %s206_s25 = int_to_ptr.hbm [resolvable:$true] %s205_s25 }
   0xf   :  { %95 = vmatpush.msra.mxu0 %v90_v0  ;;  %v88_v2 = vld [vmem:[#allocation2 + $0x68] sm:$0xff]  ;;  %v87_v3 = vld [vmem:[#allocation2 + $0x60] sm:$0xff]  ;;  %v131_v4 = vld [vmem:[#allocation5 + $0x78] sm:$0xff]  ;;  %s203_s22 = sshll.u32 %s332_s21, 4  ;;  %s204_s22 = int_to_ptr.vmem [resolvable:$true] %s203_s22 }
  0x10   :  { %v86_v5 = vld [vmem:[#allocation2 + $0x58] sm:$0xff]  ;;  %136 = vmatpush.msra.mxu1 %v131_v4  ;;  %v130_v6 = vld [vmem:[#allocation5 + $0x70] sm:$0xff]  ;;  %v129_v7 = vld [vmem:[#allocation5 + $0x68] sm:$0xff] }
  0x11   :  { %96 = vmatpush.msra.mxu0 %v89_v1  ;;  %v85_v8 = vld [vmem:[#allocation2 + $0x50] sm:$0xff]  ;;  %v128_v9 = vld [vmem:[#allocation5 + $0x60] sm:$0xff]  ;;  %v84_v10 = vld [vmem:[#allocation2 + $0x48] sm:$0xff] }
  0x12   :  { %137 = vmatpush.msra.mxu1 %v130_v6  ;;  %v127_v11 = vld [vmem:[#allocation5 + $0x58] sm:$0xff]  ;;  %v83_v12 = vld [vmem:[#allocation2 + $0x40] sm:$0xff]  ;;  %v126_v13 = vld [vmem:[#allocation5 + $0x50] sm:$0xff] }
  0x13   :  { %97 = vmatpush.msra.mxu0 %v88_v2  ;;  %v82_v14 = vld [vmem:[#allocation2 + $0x38] sm:$0xff]  ;;  %v125_v15 = vld [vmem:[#allocation5 + $0x48] sm:$0xff]  ;;  %v81_v16 = vld [vmem:[#allocation2 + $0x30] sm:$0xff] }
  0x14   :  { %138 = vmatpush.msra.mxu1 %v129_v7  ;;  %v124_v17 = vld [vmem:[#allocation5 + $0x40] sm:$0xff]  ;;  %v80_v18 = vld [vmem:[#allocation2 + $0x28] sm:$0xff]  ;;  %v123_v19 = vld [vmem:[#allocation5 + $0x38] sm:$0xff] }
  0x15   :  { %98 = vmatpush.msra.mxu0 %v87_v3  ;;  %v79_v20 = vld [vmem:[#allocation2 + $0x20] sm:$0xff]  ;;  %v122_v21 = vld [vmem:[#allocation5 + $0x30] sm:$0xff]  ;;  %v78_v22 = vld [vmem:[#allocation2 + $0x18] sm:$0xff] }
  0x16   :  { %139 = vmatpush.msra.mxu1 %v128_v9  ;;  %v121_v23 = vld [vmem:[#allocation5 + $0x28] sm:$0xff]  ;;  %v77_v24 = vld [vmem:[#allocation2 + $0x10] sm:$0xff]  ;;  %v120_v25 = vld [vmem:[#allocation5 + $0x20] sm:$0xff] }
  0x17   :  { %99 = vmatpush.msra.mxu0 %v86_v5  ;;  %v76_v26 = vld [vmem:[#allocation2 + $0x8] sm:$0xff]  ;;  %v119_v27 = vld [vmem:[#allocation5 + $0x18] sm:$0xff]  ;;  %v75_v28 = vld [vmem:[#allocation2] sm:$0xff] }
  0x18   :  { %140 = vmatpush.msra.mxu1 %v127_v11  ;;  %v74_v29 = vld [vmem:[%s397_s0] sm:$0xff]  ;;  %v118_v30 = vld [vmem:[#allocation5 + $0x10] sm:$0xff]  ;;  %v117_v31 = vld [vmem:[#allocation5 + $0x8] sm:$0xff] }
  0x19   :  { %100 = vmatpush.msra.mxu0 %v85_v8  ;;  %v116_v32 = vld [vmem:[#allocation5] sm:$0xff]  ;;  %v172_v33 = vld [vmem:[#allocation7 + $0x78] sm:$0xff]  ;;  %v171_v34 = vld [vmem:[#allocation7 + $0x70] sm:$0xff] }
  0x1a   :  { %141 = vmatpush.msra.mxu1 %v126_v13  ;;  %177 = vmatpush.msra.mxu2 %v172_v33  ;;  %v170_v35 = vld [vmem:[#allocation7 + $0x68] sm:$0xff]  ;;  %v169_v36 = vld [vmem:[#allocation7 + $0x60] sm:$0xff]  ;;  %v168_v37 = vld [vmem:[#allocation7 + $0x58] sm:$0xff] }
  0x1b   :  { %101 = vmatpush.msra.mxu0 %v84_v10  ;;  %v167_v38 = vld [vmem:[#allocation7 + $0x50] sm:$0xff]  ;;  %v166_v39 = vld [vmem:[#allocation7 + $0x48] sm:$0xff]  ;;  %v165_v40 = vld [vmem:[#allocation7 + $0x40] sm:$0xff] }
  0x1c   :  { %142 = vmatpush.msra.mxu1 %v125_v15  ;;  %178 = vmatpush.msra.mxu2 %v171_v34  ;;  %v164_v41 = vld [vmem:[#allocation7 + $0x38] sm:$0xff]  ;;  %v163_v42 = vld [vmem:[#allocation7 + $0x30] sm:$0xff]  ;;  %v162_v43 = vld [vmem:[#allocation7 + $0x28] sm:$0xff] }
  0x1d   :  { %102 = vmatpush.msra.mxu0 %v83_v12  ;;  %v161_v44 = vld [vmem:[#allocation7 + $0x20] sm:$0xff]  ;;  %v160_v45 = vld [vmem:[#allocation7 + $0x18] sm:$0xff]  ;;  %v159_v50 = vld [vmem:[#allocation7 + $0x10] sm:$0xff] }
  0x1e   :  { %143 = vmatpush.msra.mxu1 %v124_v17  ;;  %179 = vmatpush.msra.mxu2 %v170_v35  ;;  %v222_v46 = vld [vmem:[%s399_s2] ss:$0 sm:$0xff]  ;;  %v158_v51 = vld [vmem:[#allocation7 + $0x8] sm:$0xff] }
  0x1f   :  { %103 = vmatpush.msra.mxu0 %v82_v14  ;;  %v157_v52 = vld [vmem:[#allocation7] sm:$0xff] }
  0x20   :  { %144 = vmatpush.msra.mxu1 %v123_v19  ;;  %180 = vmatpush.msra.mxu2 %v169_v36  ;;  %v223_v53 = vld [vmem:[%s401_s4] ss:$0 sm:$0xff] }
  0x21   :  { %104 = vmatpush.msra.mxu0 %v81_v16  ;;  %v224_v57 = vld [vmem:[%s403_s6] ss:$0 sm:$0xff] }
  0x22   :  { %145 = vmatpush.msra.mxu1 %v122_v21  ;;  %181 = vmatpush.msra.mxu2 %v168_v37 }
  0x23   :  { %105 = vmatpush.msra.mxu0 %v80_v18 }
  0x24   :  { %146 = vmatpush.msra.mxu1 %v121_v23  ;;  %182 = vmatpush.msra.mxu2 %v167_v38 }
  0x25   :  { %106 = vmatpush.msra.mxu0 %v79_v20 }
  0x26   :  { %147 = vmatpush.msra.mxu1 %v120_v25  ;;  %183 = vmatpush.msra.mxu2 %v166_v39 }
  0x27   :  { %107 = vmatpush.msra.mxu0 %v78_v22 }
  0x28   :  { %148 = vmatpush.msra.mxu1 %v119_v27  ;;  %184 = vmatpush.msra.mxu2 %v165_v40 }
  0x29   :  { %108 = vmatpush.msra.mxu0 %v77_v24 }
  0x2a   :  { %149 = vmatpush.msra.mxu1 %v118_v30  ;;  %185 = vmatpush.msra.mxu2 %v164_v41 }
  0x2b   :  { %109 = vmatpush.msra.mxu0 %v76_v26 }
  0x2c   :  { %150 = vmatpush.msra.mxu1 %v117_v31  ;;  %186 = vmatpush.msra.mxu2 %v163_v42 }
  0x2d   :  { %110 = vmatpush.msra.mxu0 %v75_v28 }
  0x2e   :  { %111 = vmatmul.f32.vlgmr.msra.gmra.mxu0 %v74_v29  ;;  %151 = vmatpush.msra.mxu1 %v116_v32 }
  0x2f   :  { %187 = vmatpush.msra.mxu2 %v162_v43 }
  0x31   :  { %188 = vmatpush.msra.mxu2 %v161_v44 }
  0x33   :  { %189 = vmatpush.msra.mxu2 %v160_v45 }
  0x35   :  { %190 = vmatpush.msra.mxu2 %v159_v50 }
  0x37   :  { %191 = vmatpush.msra.mxu2 %v158_v51 }
  0x39   :  { %192 = vmatpush.msra.mxu2 %v157_v52 }
  0xab   :  { %v112_v47 = vpop.f32.mrf.mxu0 }
  0xac   :  { %v113_v48 = vadd.f32 %v222_v46, %v112_v47 }
  0xae   :  { %v115_v49 = vmax.f32 %v113_v48, 0.0 }
  0xb0   :  { %152 = vmatmul.f32.vlgmr.msra.gmra.mxu1 %v115_v49 }
 0x12d   :  { %v153_v54 = vpop.f32.mrf.mxu1 }
 0x12e   :  { %v154_v55 = vadd.f32 %v223_v53, %v153_v54 }
 0x130   :  { %v156_v56 = vmax.f32 %v154_v55, 0.0 }
 0x132   :  { %193 = vmatmul.f32.vlgmr.msra.gmra.mxu2 %v156_v56 }
 0x1b5   :  { %v194_v58 = vpop.f32.mrf.mxu2 }
 0x1b6   :  { %v195_v59 = vadd.f32 %v224_v57, %v194_v58 }
 0x1b8   :  { %197 = vst [vmem:[#allocation8] sm:$0xff] %v195_v59 }
 0x1b9   :  { %208 = dma.vmem_to_hbm [thread:$0]  %s204_s22, 128, %s206_s25, [#allocation4]  }
 0x1ba   :  { %325 = dma.done.wait [#allocation4], 128  }
 0x1bb   :  { %326 = vsyncadd [#allocation4], 4294967168 }
 0x1bc   :  { %213 = vsyncpa [#allocation3], 1 }
 0x1bd   :  { %214 = vsyncpa [#allocation6], 1 }
 0x1be   :  { %215 = vsyncpa [#allocation4], 1 }

</bundles_post_ra>
